<compile_context>
chip_gen: v6e
topology: v6e:2x2x1
jax: 0.10.0
libtpu: 0.0.40
codegen_flags: <defaults>
</compile_context>

<pallas_src>
import functools
import math

import jax
import jax.numpy as jnp
from jax.experimental import pallas as pl
from jax.experimental.pallas import tpu as pltpu


def _round_up(x, m):
    return (x + m - 1) // m * m


# ----------------------------------------------------------------------------
# Pallas kernels
# ----------------------------------------------------------------------------
def _mm_bias_kernel(a_ref, w_ref, b_ref, o_ref, *, relu):
    """out = (relu)(a @ w + b); bf16 inputs, f32 accumulate."""
    acc = jnp.dot(a_ref[...], w_ref[...], preferred_element_type=jnp.float32)
    acc = acc + b_ref[...]                       # (TM, Np) + (1, Np)
    if relu:
        acc = jnp.maximum(acc, 0.0)
    o_ref[...] = acc


def _fused_mlp_kernel(a_ref, w1_ref, b1_ref, w2_ref, b2_ref, o_ref):
    """out = relu(a @ w1 + b1) @ w2 + b2 — hidden activation stays in VMEM."""
    h = jnp.dot(a_ref[...], w1_ref[...], preferred_element_type=jnp.float32)
    h = jnp.maximum(h + b1_ref[...], 0.0)
    o = jnp.dot(h.astype(jnp.bfloat16), w2_ref[...],
                preferred_element_type=jnp.float32)
    o_ref[...] = o + b2_ref[...]


def _proposal_kernel(p_ref, o_ref, *, img_h, img_w, min_size_scaled):
    """Batched RPN proposal decode. One image per grid step.

    p_ref: (1, 16, A) packed rows:
        0..3  anchor (ymin, xmin, ymax, xmax)
        4..7  rpn loc (dy, dx, dh, dw)
        8..9  rpn score logits (bg, fg)
        10..15 zero padding (full 8-sublane vregs for the VPU)
    o_ref: (1, 8, A) rows 0..3 decoded/clipped box, row 4 fg score (-1 if too
        small), rows 5..7 zero.
    """
    p = p_ref[0]                                   # (16, A)
    ah = p[2:3] - p[0:1]
    aw = p[3:4] - p[1:2]
    acy = p[0:1] + 0.5 * ah
    acx = p[1:2] + 0.5 * aw
    cy = p[4:5] * ah + acy
    cx = p[5:6] * aw + acx
    # Clamp dh/dw before exp for numerical safety with untrained regressors.
    dh = jnp.clip(p[6:7], -10.0, 10.0)
    dw = jnp.clip(p[7:8], -10.0, 10.0)
    h = jnp.exp(dh) * ah
    w = jnp.exp(dw) * aw
    ymin = jnp.clip(cy - 0.5 * h, 0.0, img_h)
    xmin = jnp.clip(cx - 0.5 * w, 0.0, img_w)
    ymax = jnp.clip(cy + 0.5 * h, 0.0, img_h)
    xmax = jnp.clip(cx + 0.5 * w, 0.0, img_w)

    # Objectness softmax over (bg, fg); divide goes to the EUP (approx recip).
    m = jnp.maximum(p[8:9], p[9:10])
    e_bg = jnp.exp(p[8:9] - m)
    e_fg = jnp.exp(p[9:10] - m)
    fg = e_fg * pl.reciprocal(e_bg + e_fg, approx=True)
    keep = jnp.logical_and(ymax - ymin >= min_size_scaled,
                           xmax - xmin >= min_size_scaled)
    fg = jnp.where(keep, fg, -1.0)
    zeros = jnp.zeros_like(fg)
    o_ref[0] = jnp.concatenate([ymin, xmin, ymax, xmax, fg, zeros, zeros, zeros],
                               axis=0)


# ----------------------------------------------------------------------------
# Pallas call wrappers
# ----------------------------------------------------------------------------
_TILE_M = 256  # rows per grid step; small enough for v7x's 32 MiB scoped VMEM


def _prep_rows(a, tile_m):
    """bf16-cast `a` and pad rows to a multiple of the chosen tile size."""
    M, K = a.shape
    tm = min(tile_m, _round_up(M, 8))
    Mp = _round_up(M, tm)
    a_bf = a.astype(jnp.bfloat16)
    if Mp != M:
        a_bf = jnp.zeros((Mp, K), jnp.bfloat16).at[:M].set(a_bf)
    return a_bf, tm, Mp


def pallas_linear_packed(a, wp, bp, n_out, relu=False, tile_m=_TILE_M):
    """a: (M, K) -> (M, n_out).  wp: (K, Np) bf16 pre-packed, bp: (1, Np) f32."""
    M, K = a.shape
    Kw, Np = wp.shape
    assert K == Kw, (K, Kw)
    a_bf, tm, Mp = _prep_rows(a, tile_m)
    out = pl.pallas_call(
        functools.partial(_mm_bias_kernel, relu=relu),
        grid=(Mp // tm,),
        in_specs=[
            pl.BlockSpec((tm, K), lambda i: (i, 0)),
            pl.BlockSpec((K, Np), lambda i: (0, 0)),
            pl.BlockSpec((1, Np), lambda i: (0, 0)),
        ],
        out_specs=pl.BlockSpec((tm, Np), lambda i: (i, 0)),
        out_shape=jax.ShapeDtypeStruct((Mp, Np), jnp.float32),
        compiler_params=pltpu.CompilerParams(dimension_semantics=("parallel",)),
        cost_estimate=pl.CostEstimate(
            flops=2 * Mp * K * Np, transcendentals=0,
            bytes_accessed=Mp * K * 2 + K * Np * 2 + Mp * Np * 4),
    )(a_bf, wp, bp)
    return out[:M, :n_out]


def pallas_fused_mlp_packed(a, w1p, b1p, w2p, b2p, n_out, tile_m=_TILE_M):
    """out = relu(a @ w1 + b1) @ w2 + b2, sliced to n_out columns."""
    M, K = a.shape
    K1, N1 = w1p.shape
    K2, N2 = w2p.shape
    assert K == K1 and N1 == K2, (K, K1, N1, K2)
    a_bf, tm, Mp = _prep_rows(a, tile_m)
    out = pl.pallas_call(
        _fused_mlp_kernel,
        grid=(Mp // tm,),
        in_specs=[
            pl.BlockSpec((tm, K), lambda i: (i, 0)),
            pl.BlockSpec((K1, N1), lambda i: (0, 0)),
            pl.BlockSpec((1, N1), lambda i: (0, 0)),
            pl.BlockSpec((K2, N2), lambda i: (0, 0)),
            pl.BlockSpec((1, N2), lambda i: (0, 0)),
        ],
        out_specs=pl.BlockSpec((tm, N2), lambda i: (i, 0)),
        out_shape=jax.ShapeDtypeStruct((Mp, N2), jnp.float32),
        compiler_params=pltpu.CompilerParams(dimension_semantics=("parallel",)),
        cost_estimate=pl.CostEstimate(
            flops=2 * Mp * (K * N1 + N1 * N2), transcendentals=0,
            bytes_accessed=Mp * K * 2 + K1 * N1 * 2 + K2 * N2 * 2 + Mp * N2 * 4),
    )(a_bf, w1p, b1p, w2p, b2p)
    return out[:M, :n_out]


def pallas_proposals_batched(anchors, rpn_locs, rpn_scores, img_size, scale,
                             min_size=2.0):
    """anchors: (A, 4); rpn_locs: (N, A, 4); rpn_scores: (N, A, 2).

    Returns boxes (N, A, 4) and fg score (N, A) from one batched pallas_call."""
    N, A, _ = rpn_locs.shape
    packed = jnp.zeros((N, 16, A), jnp.float32)
    packed = packed.at[:, 0:4].set(
        jnp.broadcast_to(anchors.T.astype(jnp.float32), (N, 4, A)))
    packed = packed.at[:, 4:8].set(
        jnp.transpose(rpn_locs.astype(jnp.float32), (0, 2, 1)))
    packed = packed.at[:, 8:10].set(
        jnp.transpose(rpn_scores.astype(jnp.float32), (0, 2, 1)))

    kernel = functools.partial(
        _proposal_kernel,
        img_h=float(img_size[0]), img_w=float(img_size[1]),
        min_size_scaled=float(min_size) * float(scale))
    out = pl.pallas_call(
        kernel,
        grid=(N,),
        in_specs=[pl.BlockSpec((1, 16, A), lambda n: (n, 0, 0))],
        out_specs=pl.BlockSpec((1, 8, A), lambda n: (n, 0, 0)),
        out_shape=jax.ShapeDtypeStruct((N, 8, A), jnp.float32),
        compiler_params=pltpu.CompilerParams(dimension_semantics=("parallel",)),
    )(packed)
    boxes = jnp.transpose(out[:, 0:4, :], (0, 2, 1))   # (N, A, 4)
    fg = out[:, 4, :]                                  # (N, A)
    return boxes, fg


# ----------------------------------------------------------------------------
# JAX glue (im2col, anchors, RoI pooling, weight packing)
# ----------------------------------------------------------------------------
def im2col(x_nhwc, kh, kw, stride, padding):
    # TODO(synk): at realistic resolutions this 9x patch materialization should
    # be fused into the conv kernel (sum of shifted matmuls) to avoid HBM blow-up.
    N, H, W, C = x_nhwc.shape
    xp = jnp.pad(x_nhwc, ((0, 0), (padding, padding), (padding, padding), (0, 0)))
    Ho = (H + 2 * padding - kh) // stride + 1
    Wo = (W + 2 * padding - kw) // stride + 1
    cols = []
    for i in range(kh):
        for j in range(kw):
            cols.append(xp[:, i:i + stride * Ho:stride, j:j + stride * Wo:stride, :])
    patches = jnp.concatenate(cols, axis=-1).reshape(N * Ho * Wo, kh * kw * C)
    return patches.astype(jnp.bfloat16), Ho, Wo


def pack_weight(w, k_pad_to=None):
    """(K, N) -> bf16 (Kp, round_up(N, 128)); zero padding keeps results exact."""
    K, N = w.shape
    Kp = K if k_pad_to is None else k_pad_to
    Np = _round_up(N, 128)
    return jnp.zeros((Kp, Np), jnp.bfloat16).at[:K, :N].set(w.astype(jnp.bfloat16))


def pack_bias(b):
    N = b.shape[0]
    Np = _round_up(N, 128)
    return jnp.zeros((1, Np), jnp.float32).at[:, :N].set(b.astype(jnp.float32))


def generate_anchors(feat_h, feat_w, feat_stride, base_size=4.0,
                     ratios=(0.5, 1.0, 2.0)):
    base = []
    for r in ratios:
        h = base_size * math.sqrt(r)
        w = base_size * math.sqrt(1.0 / r)
        base.append([-h / 2.0, -w / 2.0, h / 2.0, w / 2.0])
    base = jnp.asarray(base, jnp.float32)                       # (A0, 4)
    sy = jnp.arange(feat_h, dtype=jnp.float32) * feat_stride
    sx = jnp.arange(feat_w, dtype=jnp.float32) * feat_stride
    yy, xx = jnp.meshgrid(sy, sx, indexing="ij")
    shifts = jnp.stack([yy.ravel(), xx.ravel(), yy.ravel(), xx.ravel()], axis=1)
    anchors = shifts[:, None, :] + base[None, :, :]             # (K, A0, 4)
    return anchors.reshape(-1, 4)


def roi_pool_2x2(feat_nhwc, rois, roi_indices, feat_stride):
    # TODO(synk): exact RoIPool/RoIAlign (adaptive binning with max/avg) has no
    # clean Pallas equivalent; this uses a 2x2 nearest-neighbor sample grid.
    N, Hf, Wf, C = feat_nhwc.shape
    ymin, xmin, ymax, xmax = rois[:, 0], rois[:, 1], rois[:, 2], rois[:, 3]
    pooled = []
    for py in range(2):
        for px in range(2):
            y = ymin + (py + 0.5) / 2.0 * (ymax - ymin)
            x = xmin + (px + 0.5) / 2.0 * (xmax - xmin)
            fy = jnp.clip(jnp.round(y / feat_stride).astype(jnp.int32), 0, Hf - 1)
            fx = jnp.clip(jnp.round(x / feat_stride).astype(jnp.int32), 0, Wf - 1)
            pooled.append(feat_nhwc[roi_indices, fy, fx, :])
    return jnp.concatenate(pooled, axis=-1)                     # (R', 4*C)


# ----------------------------------------------------------------------------
# FasterRCNN (extractor + RPN + head), deterministic synthetic parameters
# ----------------------------------------------------------------------------
class FasterRCNNPallas:
    def __init__(self, key, in_ch=3, feat_ch=16, mid_ch=16, n_anchor=3,
                 n_class=5, fc_dim=32, feat_stride=2, n_post_proposals=32,
                 loc_normalize_mean=(0.0, 0.0, 0.0, 0.0),
                 loc_normalize_std=(0.1, 0.1, 0.2, 0.2)):
        self.feat_ch = feat_ch
        self.mid_ch = mid_ch
        self.n_anchor = n_anchor
        self.n_class = n_class
        self.feat_stride = feat_stride
        self.n_post = n_post_proposals
        self.loc_normalize_mean = loc_normalize_mean
        self.loc_normalize_std = loc_normalize_std
        self.nms_thresh = 0.3      # use_preset('evaluate')
        self.score_thresh = 0.05

        ks = jax.random.split(key, 14)
        init = lambda k, shape, std=0.01: std * jax.random.normal(k, shape, jnp.float32)
        # extractor: conv3x3 stride 2
        self.w_ext = init(ks[0], (3, 3, in_ch, feat_ch))
        self.b_ext = init(ks[1], (feat_ch,))
        # RPN shared conv3x3
        self.w_rpn = init(ks[2], (3, 3, feat_ch, mid_ch))
        self.b_rpn = init(ks[3], (mid_ch,))
        # RPN 1x1 heads
        self.w_loc = init(ks[4], (mid_ch, n_anchor * 4))
        self.b_loc = init(ks[5], (n_anchor * 4,))
        self.w_sco = init(ks[6], (mid_ch, n_anchor * 2))
        self.b_sco = init(ks[7], (n_anchor * 2,))
        # head: fc over 2x2 RoI pool, then cls_loc / score
        self.w_fc = init(ks[8], (4 * feat_ch, fc_dim))
        self.b_fc = init(ks[9], (fc_dim,))
        self.w_cls_loc = init(ks[10], (fc_dim, n_class * 4), std=0.001)
        self.b_cls_loc = init(ks[11], (n_class * 4,), std=0.001)
        self.w_cls_sco = init(ks[12], (fc_dim, n_class))
        self.b_cls_sco = init(ks[13], (n_class,))

        # --- pre-packed (bf16, lane-padded, heads fused) weights ------------
        self.wp_ext = pack_weight(self.w_ext.reshape(9 * in_ch, feat_ch))
        self.bp_ext = pack_bias(self.b_ext)

        self.wp_rpn = pack_weight(self.w_rpn.reshape(9 * feat_ch, mid_ch))   # K=9*feat_ch
        self.bp_rpn = pack_bias(self.b_rpn)
        w_heads = jnp.concatenate([self.w_loc, self.w_sco], axis=1)          # (mid, 6A0)
        b_heads = jnp.concatenate([self.b_loc, self.b_sco], axis=0)
        self.n_rpn_head = w_heads.shape[1]
        self.wp_rpn_heads = pack_weight(w_heads, k_pad_to=self.wp_rpn.shape[1])
        self.bp_rpn_heads = pack_bias(b_heads)

        self.wp_fc = pack_weight(self.w_fc)
        self.bp_fc = pack_bias(self.b_fc)
        w_out = jnp.concatenate([self.w_cls_loc, self.w_cls_sco], axis=1)    # (fc, 5C)
        b_out = jnp.concatenate([self.b_cls_loc, self.b_cls_sco], axis=0)
        self.n_head_out = w_out.shape[1]
        self.wp_head_out = pack_weight(w_out, k_pad_to=self.wp_fc.shape[1])
        self.bp_head_out = pack_bias(b_out)

    def __call__(self, x_nchw, scale=1.0):
        img_size = x_nchw.shape[2:]
        x = jnp.transpose(x_nchw, (0, 2, 3, 1)).astype(jnp.float32)  # NCHW -> NHWC
        N = x.shape[0]

        # 1) Feature extraction: 3x3/stride-2 conv as tiled im2col matmul + ReLU
        patches, Hf, Wf = im2col(x, 3, 3, self.feat_stride, 1)
        h = pallas_linear_packed(patches, self.wp_ext, self.bp_ext,
                                 self.feat_ch, relu=True)
        h = h.reshape(N, Hf, Wf, self.feat_ch)

        # 2) RPN: 3x3 conv + ReLU + both 1x1 heads fused into one kernel
        patches2, _, _ = im2col(h, 3, 3, 1, 1)
        rpn_out = pallas_fused_mlp_packed(
            patches2, self.wp_rpn, self.bp_rpn,
            self.wp_rpn_heads, self.bp_rpn_heads, self.n_rpn_head)
        A = Hf * Wf * self.n_anchor
        rpn_locs = rpn_out[:, :self.n_anchor * 4].reshape(N, A, 4)
        rpn_scores = rpn_out[:, self.n_anchor * 4:].reshape(N, A, 2)

        # Proposal decode/clip/score for the whole batch in one kernel.
        anchors = generate_anchors(Hf, Wf, self.feat_stride)
        boxes, fg = pallas_proposals_batched(anchors, rpn_locs, rpn_scores,
                                             img_size, scale)
        # TODO(synk): NMS has no clean Pallas equivalent; select top-K proposals
        # by foreground score instead (small boxes already suppressed above).
        _, top_idx = jax.lax.top_k(fg, self.n_post)                   # (N, n_post)
        rois = jnp.take_along_axis(boxes, top_idx[..., None], axis=1)
        rois = rois.reshape(N * self.n_post, 4)
        roi_indices = jnp.repeat(jnp.arange(N, dtype=jnp.int32), self.n_post)

        # 3) Localization & classification head: FC(+ReLU) + cls_loc/score fused
        pooled = roi_pool_2x2(h, rois, roi_indices, self.feat_stride)
        head_out = pallas_fused_mlp_packed(
            pooled, self.wp_fc, self.bp_fc,
            self.wp_head_out, self.bp_head_out, self.n_head_out)
        roi_cls_locs = head_out[:, :self.n_class * 4]
        roi_scores = head_out[:, self.n_class * 4:]
        return roi_cls_locs, roi_scores, rois, roi_indices


if __name__ == "__main__":
    key = jax.random.PRNGKey(0)
    k_param, k_x = jax.random.split(key)
    model = FasterRCNNPallas(k_param)

    x = jax.random.normal(k_x, (2, 3, 32, 32), jnp.float32)   # small NCHW image batch
    roi_cls_locs, roi_scores, rois, roi_indices = model(x, scale=1.0)
    jax.block_until_ready((roi_cls_locs, roi_scores, rois, roi_indices))

    R = 2 * model.n_post
    assert roi_cls_locs.shape == (R, model.n_class * 4)
    assert roi_scores.shape == (R, model.n_class)
    assert rois.shape == (R, 4)
    assert roi_indices.shape == (R,)
    assert bool(jnp.all(jnp.isfinite(roi_cls_locs)))
    assert bool(jnp.all(jnp.isfinite(roi_scores)))
    assert bool(jnp.all(jnp.isfinite(rois)))
    print("KERNEL_OK")
</pallas_src>

<mosaic_0001>
module attributes {stable_mosaic.version = 11 : i64} {
  func.func @_mm_bias_kernel(%arg0: i32, %arg1: memref<256x27xbf16, #tpu.memory_space<vmem>>, %arg2: memref<27x128xbf16, #tpu.memory_space<vmem>>, %arg3: memref<1x128xf32, #tpu.memory_space<vmem>>, %arg4: memref<256x128xf32, #tpu.memory_space<vmem>>) attributes {dimension_semantics = [#tpu.dimension_semantics<parallel>], iteration_bounds = array<i64: 2>, scalar_prefetch = 0 : i64, scratch_operands = 0 : i64, tpu.core_type = #tpu.core_type<tc>, window_params = [{transform_indices = @transform_0, window_bounds = array<i64: 256, 27>}, {pipeline_mode = #tpu.pipeline_mode<synchronous>, transform_indices = @transform_1, window_bounds = array<i64: 27, 128>}, {pipeline_mode = #tpu.pipeline_mode<synchronous>, transform_indices = @transform_2, window_bounds = array<i64: 1, 128>}, {transform_indices = @transform_3, window_bounds = array<i64: 256, 128>}]} {
    %c0 = arith.constant 0 : index
    %c0_0 = arith.constant 0 : index
    %0 = vector.load %arg1[%c0, %c0_0] : memref<256x27xbf16, #tpu.memory_space<vmem>>, vector<256x27xbf16>
    %c0_1 = arith.constant 0 : index
    %c0_2 = arith.constant 0 : index
    %1 = vector.load %arg2[%c0_1, %c0_2] : memref<27x128xbf16, #tpu.memory_space<vmem>>, vector<27x128xbf16>
    %cst = arith.constant dense<0.000000e+00> : vector<256x128xf32>
    %2 = tpu.matmul %0, %1, %cst {dimension_numbers = #tpu.dot_dimension_numbers<[1], [0], [0], [1], [0, 0, 1, 1], [], []>} : vector<256x27xbf16>, vector<27x128xbf16>, vector<256x128xf32> -> vector<256x128xf32>
    %c0_3 = arith.constant 0 : index
    %c0_4 = arith.constant 0 : index
    %3 = vector.load %arg3[%c0_3, %c0_4] : memref<1x128xf32, #tpu.memory_space<vmem>>, vector<1x128xf32>
    %4 = vector.broadcast %3 : vector<1x128xf32> to vector<256x128xf32>
    %5 = arith.addf %2, %4 : vector<256x128xf32>
    %cst_5 = arith.constant 0.000000e+00 : f32
    %6 = vector.broadcast %cst_5 : f32 to vector<256x128xf32>
    %7 = arith.maximumf %5, %6 : vector<256x128xf32>
    %c0_6 = arith.constant 0 : index
    %c0_7 = arith.constant 0 : index
    %8 = vector.load %arg4[%c0_6, %c0_7] : memref<256x128xf32, #tpu.memory_space<vmem>>, vector<256x128xf32>
    tpu.vector_store %arg4[%c0_6, %c0_7], %7 {strides = array<i32>} : memref<256x128xf32, #tpu.memory_space<vmem>>, vector<256x128xf32>,
    return
  }
  func.func @transform_0(%arg0: i32) -> (i32, i32) {
    %c0_i32 = arith.constant 0 : i32
    %c0_i32_0 = arith.constant 0 : i32
    return %arg0, %c0_i32 : i32, i32
  }
  func.func @transform_1(%arg0: i32) -> (i32, i32) {
    %c0_i32 = arith.constant 0 : i32
    %c0_i32_0 = arith.constant 0 : i32
    %c0_i32_1 = arith.constant 0 : i32
    return %c0_i32, %c0_i32_0 : i32, i32
  }
  func.func @transform_2(%arg0: i32) -> (i32, i32) {
    %c0_i32 = arith.constant 0 : i32
    %c0_i32_0 = arith.constant 0 : i32
    %c0_i32_1 = arith.constant 0 : i32
    return %c0_i32, %c0_i32_0 : i32, i32
  }
  func.func @transform_3(%arg0: i32) -> (i32, i32) {
    %c0_i32 = arith.constant 0 : i32
    %c0_i32_0 = arith.constant 0 : i32
    return %arg0, %c0_i32 : i32, i32
  }
}

</mosaic_0001>

<bundles_post_ra>
// kernel: tpu_custom_call.1
= control target key start
LH: loop header
LB: loop body
LE: loop exit
PB: predicated region body
PF: predicated region fallthrough
CT: control target
= control target key end

     0   :  { %8 = vsyncpa [#allocation3], 0  ;;  %s1133_s0 = inlined_call_operand.vmem [shape: bf16[512,27], index: 0, kind: input, shape index: {}]   ;;  %s1134_s1 = inlined_call_operand.vmem [shape: bf16[27,128], index: 1, kind: input, shape index: {}]   ;;  %s1135_s2 = inlined_call_operand.vmem [shape: f32[1,128], index: 2, kind: input, shape index: {}]   ;;  %s1136_s3 = inlined_call_operand.hbm [shape: f32[512,128], index: 3, kind: output, shape index: {}]  }
   0x1   :  { %10 = vsyncpa [#allocation3 + $0x1], 0  ;;  %s916_s12 = smov 0   ;;  %s918_s13 = smov 0  }
   0x2   :  { %s920_s14 = smov 0   ;;  %s922_s15 = smov 0  }
   0x3 LB: > { %s937_s16 = sadd.s32 4294967295, %s890_s15   ;;  %s664_s17 = sadd.s32 4294967294, %s890_s15   ;;  %s890_s15 = sphi %s922_s15, %s1142_s15   ;;  %s886_s14 = sphi %s920_s14, %s1141_s14   ;;  %s882_s13 = sphi %s918_s13, %s1140_s13   ;;  %s878_s12 = sphi %s916_s12, %s1139_s12  }
   0x4   : > { %s941_s18 = sadd.s32 1, %s890_s15   ;;  %s91_s19 = sadd.s32 1, %s886_s14 }
   0x5   : > { %s88_s20 = ssub.s32 %s890_s15, %s941_s18  ;;  %p101_p0 = scmp.ne.s32.totalorder %s886_s14, %s882_s13 }
   0x6   : > { %p89_p1 = scmp.eq.s32.totalorder %s88_s20, 0  ;;  %p102_p2 = scmp.eq.s32.totalorder %s937_s16, 1 }
   0x7   : > { %p107_p3 = scmp.ne.s32.totalorder %s882_s13, %s878_s12  ;;  %p108_p4 = scmp.eq.s32.totalorder %s664_s17, 1 }
   0x8   : > { %s952_s21 = scalar_select %p89_p1, %s886_s14, %s91_s19  }
   0x9   : > { %p954_p5 = por %p102_p2, %p101_p0  ;;  %p958_p6 = por %p108_p4, %p107_p3 }
   0xa   : > { %p667_p7 = scmp.ge.s32.totalorder %s890_s15, 1  ;;  %p141_p8 = scmp.lt.s32.totalorder %s890_s15, 3 }
   0xc   : > { %p142_p9 = pnand %p667_p7, %p141_p8 }
   0xd   : > { %s669_s26 = sshll.u32 (!%p142_p9), %s937_s16, 5  ;;  %s162_s6 = sand.u32 (!%p142_p9), 1, %s882_s13  }
   0xe   : > { %145 = sbr.rel (%p142_p9) target bundleno = 273 (0x111), region = 32  ;;  %p166_p10 = scmp.lt.s32.totalorder (!%p142_p9), %s669_s26, 63 }
   0xf   : > { %s668_s9 = sshll.u32 (!%p142_p9), %s162_s6, 8  ;;  %s711_s11 = sshll.u32 (!%p142_p9), %s937_s16, 12 }
  0x10   : > { %s1020_s10 = scalar_lea.vmem (!%p142_p9), [#allocation2], %s668_s9  ;;  %s1083_s24 = scalar_lea.hbm (!%p142_p9), %s1136_s3, %s711_s11 }
  0x11   : > { %s602_s17 = sshll.u32 (!%p142_p9), %s1020_s10, 4  ;;  %s1093_s16 = scalar_lea.sflag (!%p142_p9), [#allocation3], %s162_s6  ;;  %s1085_s17 = int_to_ptr.vmem [resolvable:$true] %s602_s17 }
  0x12   : > { %s830_s25 = scalar_lea.vmem (!%p142_p9), %s1085_s17, 4096 }
  0x13   : > { %v812_v0 = vld [vmem:[%s1134_s1 + $0x8] sm:$0x3f]   ;;  %vm356_vm0 = vcmask 1044480   ;;  %vm357_vm1 = vcmask 1045504   ;;  %v892_v1 = vmov 65535   ;;  %v813_v5 = vld [vmem:[%s1134_s1] sm:$0xff]   ;;  %p831_p11 = scmp.ne.s32.totalorder %s1085_s17, %s830_s25 }
  0x14   : > { %v358_v2 = vsel %vm356_vm0, 4294967295, %v892_v1  ;;  %s1144_s26 = smov (!%p166_p10, %s669_s26), 63  ;;  %vm307_vm2 = vcmask 220160   ;;  %v1012_v22 = vld [vmem:[%s1135_s2] ss:$0 sm:$0xff] }
  0x15   : > { %v359_v3 = vsel %vm357_vm1, %v358_v2, 0  ;;  %s670_s29 = sshll.u32 %s1144_s26, 2  ;;  %p832_p12 = pnand %p831_p11, %p954_p5 }
  0x16   : > { %v361_v4 = vand.u32 %v812_v0, %v359_v3  ;;  %s974_s5 = scalar_lea.vmem %s1133_s0, %s670_s29  ;;  %s893_s26 = smov [#allocation2]  }
  0x17   : > { %v814_v6 = vld [vmem:[%s974_s5] sm:$0xff]   ;;  %v816_v8 = vld [vmem:[%s974_s5 + $0x8] sm:$0xff]   ;;  %v818_v10 = vld [vmem:[%s974_s5 + $0x10] sm:$0xff]   ;;  %p833_p13 = pneg %p832_p12  ;;  %s834_s27 = sshll.u32 %s893_s26, 4  ;;  %s835_s27 = int_to_ptr.vmem [resolvable:$false] %s834_s27 }
  0x18   : > { %730 = vmatprep.subr.bf16.mxu0 %v361_v4  ;;  %766 = vmatprep.subr.bf16.mxu1 %v361_v4  ;;  %v815_v7 = vld [vmem:[%s974_s5 + $0x40] sm:$0xff]   ;;  %v817_v9 = vld [vmem:[%s974_s5 + $0x48] sm:$0xff]   ;;  %v819_v11 = vld [vmem:[%s974_s5 + $0x50] sm:$0xff]   ;;  %s836_s28 = scalar_lea.vmem %s835_s27, 8192  ;;  %p837_p0 = scmp.lt.s32.totalorder %s1085_s17, %s835_s27 }
  0x19   : > { %731 = vmatpush3.bf16.msra.mxu0 %v361_v4  ;;  %768 = vmatpush3.bf16.msra.mxu1 %v361_v4  ;;  %v820_v12 = vld [vmem:[%s974_s5 + $0x18] sm:$0xff]   ;;  %v822_v14 = vld [vmem:[%s974_s5 + $0x20] sm:$0xff]   ;;  %v824_v16 = vld [vmem:[%s974_s5 + $0x28] sm:$0xff]   ;;  %p838_p1 = scmp.lt.s32.totalorder %s836_s28, %s830_s25 }
  0x1a   : > { %732 = vmatprep.subr.bf16.mxu0 %v813_v5  ;;  %767 = vmatprep.subr.bf16.mxu1 %v813_v5  ;;  %v821_v13 = vld [vmem:[%s974_s5 + $0x58] sm:$0xff]   ;;  %v823_v15 = vld [vmem:[%s974_s5 + $0x60] sm:$0xff]   ;;  %v825_v17 = vld [vmem:[%s974_s5 + $0x68] sm:$0xff]  }
  0x1b   : > { %734 = vmatprep.mubr.msk.bf16.mxu0 %vm307_vm2, %v814_v6  ;;  %750 = vmatprep.mubr.msk.bf16.mxu1 %vm307_vm2, %v815_v7  ;;  %v826_v18 = vld [vmem:[%s974_s5 + $0x30] sm:$0xff]   ;;  %v828_v20 = vld [vmem:[%s974_s5 + $0x38] sm:$0xff]   ;;  %p839_p2 = por %p838_p1, %p837_p0 }
  0x1c   : > { %v827_v19 = vld [vmem:[%s974_s5 + $0x70] sm:$0xff]   ;;  %v829_v21 = vld [vmem:[%s974_s5 + $0x78] sm:$0xff]  }
  0x1d   : > { %733 = vmatpush3.bf16.msra.mxu0 %v813_v5  ;;  %769 = vmatpush3.bf16.msra.mxu1 %v813_v5  ;;  %p840_p3 = pnand %p839_p2, %p833_p13 }
  0x20   : > { %735 = vmatmul.mubr.msk.bf16.vlgmr.msra.gmra.mxu0 %vm307_vm2, %v816_v8  ;;  %751 = vmatmul.mubr.msk.bf16.vlgmr.msra.gmra.mxu1 %vm307_vm2, %v817_v9 }
  0x21   : > { %738 = vmatprep.mubr.msk.bf16.mxu0 %vm307_vm2, %v818_v10  ;;  %754 = vmatprep.mubr.msk.bf16.mxu1 %vm307_vm2, %v819_v11 }
  0x28   : > { %739 = vmatmul.mubr.msk.bf16.gmra.mxu0 %vm307_vm2, %v820_v12  ;;  %755 = vmatmul.mubr.msk.bf16.gmra.mxu1 %vm307_vm2, %v821_v13 }
  0x29   : > { %742 = vmatprep.mubr.msk.bf16.mxu0 %vm307_vm2, %v822_v14  ;;  %758 = vmatprep.mubr.msk.bf16.mxu1 %vm307_vm2, %v823_v15 }
  0x30   : > { %743 = vmatmul.mubr.msk.bf16.gmra.mxu0 %vm307_vm2, %v824_v16  ;;  %759 = vmatmul.mubr.msk.bf16.gmra.mxu1 %vm307_vm2, %v825_v17 }
  0x31   : > { %746 = vmatprep.mubr.msk.bf16.mxu0 %vm307_vm2, %v826_v18  ;;  %762 = vmatprep.mubr.msk.bf16.mxu1 %vm307_vm2, %v827_v19 }
  0x38   : > { %747 = vmatmul.mubr.msk.bf16.gmra.mxu0 %vm307_vm2, %v828_v20  ;;  %763 = vmatmul.mubr.msk.bf16.gmra.mxu1 %vm307_vm2, %v829_v21 }
  0xe0   : > { %v736_v23 = vpop.f32.mrf.mxu0  ;;  %v752_v24 = vpop.f32.mrf.mxu1 }
  0xe1   : > { %v406_v25 = vadd.f32 %v736_v23, %v1012_v22  ;;  %v470_v26 = vadd.f32 %v752_v24, %v1012_v22 }
  0xe2   : > { %v397_v27 = vpop.f32.mrf.mxu0  ;;  %v461_v28 = vpop.f32.mrf.mxu1 }
  0xe3   : > { %v526_v29 = vmax.f32 %v406_v25, 0.0  ;;  %v542_v30 = vmax.f32 %v470_v26, 0.0  ;;  %v398_v31 = vadd.f32 %v1012_v22, %v397_v27  ;;  %v462_v32 = vadd.f32 %v1012_v22, %v461_v28 }
  0xe4   : > { %v737_v33 = vpop.f32.mrf.mxu0  ;;  %v753_v34 = vpop.f32.mrf.mxu1 }
  0xe5   : > { %558 = vst [vmem:[%s1020_s10 + $0x10] sm:$0xff] %v526_v29  ;;  %574 = vst [vmem:[%s1020_s10 + $0x90] sm:$0xff] %v542_v30  ;;  %v524_v35 = vmax.f32 %v398_v31, 0.0  ;;  %v540_v36 = vmax.f32 %v462_v32, 0.0  ;;  %v409_v37 = vadd.f32 %v737_v33, %v1012_v22  ;;  %v473_v38 = vadd.f32 %v753_v34, %v1012_v22 }
  0xe6   : > { %v400_v39 = vpop.f32.mrf.mxu0  ;;  %v464_v40 = vpop.f32.mrf.mxu1 }
  0xe7   : > { %556 = vst [vmem:[%s1020_s10] sm:$0xff] %v524_v35  ;;  %572 = vst [vmem:[%s1020_s10 + $0x80] sm:$0xff] %v540_v36  ;;  %v527_v41 = vmax.f32 %v409_v37, 0.0  ;;  %v543_v42 = vmax.f32 %v473_v38, 0.0  ;;  %v401_v43 = vadd.f32 %v1012_v22, %v400_v39  ;;  %v465_v44 = vadd.f32 %v1012_v22, %v464_v40 }
  0xe8   : > { %v740_v45 = vpop.f32.mrf.mxu0  ;;  %v756_v46 = vpop.f32.mrf.mxu1 }
  0xe9   : > { %559 = vst [vmem:[%s1020_s10 + $0x18] sm:$0xff] %v527_v41  ;;  %575 = vst [vmem:[%s1020_s10 + $0x98] sm:$0xff] %v543_v42  ;;  %v525_v47 = vmax.f32 %v401_v43, 0.0  ;;  %v541_v48 = vmax.f32 %v465_v44, 0.0  ;;  %v422_v49 = vadd.f32 %v740_v45, %v1012_v22  ;;  %v486_v50 = vadd.f32 %v756_v46, %v1012_v22 }
  0xea   : > { %v413_v51 = vpop.f32.mrf.mxu0  ;;  %v477_v52 = vpop.f32.mrf.mxu1 }
  0xeb   : > { %557 = vst [vmem:[%s1020_s10 + $0x8] sm:$0xff] %v525_v47  ;;  %573 = vst [vmem:[%s1020_s10 + $0x88] sm:$0xff] %v541_v48  ;;  %v530_v53 = vmax.f32 %v422_v49, 0.0  ;;  %v546_v54 = vmax.f32 %v486_v50, 0.0  ;;  %v414_v55 = vadd.f32 %v1012_v22, %v413_v51  ;;  %v478_v56 = vadd.f32 %v1012_v22, %v477_v52 }
  0xec   : > { %v741_v57 = vpop.f32.mrf.mxu0  ;;  %v757_v58 = vpop.f32.mrf.mxu1 }
  0xed   : > { %562 = vst [vmem:[%s1020_s10 + $0x30] sm:$0xff] %v530_v53  ;;  %578 = vst [vmem:[%s1020_s10 + $0xb0] sm:$0xff] %v546_v54  ;;  %v528_v59 = vmax.f32 %v414_v55, 0.0  ;;  %v544_v60 = vmax.f32 %v478_v56, 0.0  ;;  %v425_v61 = vadd.f32 %v741_v57, %v1012_v22  ;;  %v489_v62 = vadd.f32 %v757_v58, %v1012_v22 }
  0xee   : > { %v416_v63 = vpop.f32.mrf.mxu0  ;;  %v480_v0 = vpop.f32.mrf.mxu1 }
  0xef   : > { %560 = vst [vmem:[%s1020_s10 + $0x20] sm:$0xff] %v528_v59  ;;  %576 = vst [vmem:[%s1020_s10 + $0xa0] sm:$0xff] %v544_v60  ;;  %v531_v1 = vmax.f32 %v425_v61, 0.0  ;;  %v547_v2 = vmax.f32 %v489_v62, 0.0  ;;  %v417_v3 = vadd.f32 %v1012_v22, %v416_v63  ;;  %v481_v4 = vadd.f32 %v1012_v22, %v480_v0 }
  0xf0   : > { %v744_v5 = vpop.f32.mrf.mxu0  ;;  %v760_v6 = vpop.f32.mrf.mxu1 }
  0xf1   : > { %563 = vst [vmem:[%s1020_s10 + $0x38] sm:$0xff] %v531_v1  ;;  %579 = vst [vmem:[%s1020_s10 + $0xb8] sm:$0xff] %v547_v2  ;;  %v529_v7 = vmax.f32 %v417_v3, 0.0  ;;  %v545_v8 = vmax.f32 %v481_v4, 0.0  ;;  %v438_v9 = vadd.f32 %v744_v5, %v1012_v22  ;;  %v502_v10 = vadd.f32 %v760_v6, %v1012_v22 }
  0xf2   : > { %v429_v11 = vpop.f32.mrf.mxu0  ;;  %v493_v12 = vpop.f32.mrf.mxu1 }
  0xf3   : > { %561 = vst [vmem:[%s1020_s10 + $0x28] sm:$0xff] %v529_v7  ;;  %577 = vst [vmem:[%s1020_s10 + $0xa8] sm:$0xff] %v545_v8  ;;  %v534_v13 = vmax.f32 %v438_v9, 0.0  ;;  %v550_v14 = vmax.f32 %v502_v10, 0.0  ;;  %v430_v15 = vadd.f32 %v1012_v22, %v429_v11  ;;  %v494_v16 = vadd.f32 %v1012_v22, %v493_v12 }
  0xf4   : > { %v745_v17 = vpop.f32.mrf.mxu0  ;;  %v761_v18 = vpop.f32.mrf.mxu1 }
  0xf5   : > { %566 = vst [vmem:[%s1020_s10 + $0x50] sm:$0xff] %v534_v13  ;;  %582 = vst [vmem:[%s1020_s10 + $0xd0] sm:$0xff] %v550_v14  ;;  %v532_v19 = vmax.f32 %v430_v15, 0.0  ;;  %v548_v20 = vmax.f32 %v494_v16, 0.0  ;;  %v441_v21 = vadd.f32 %v745_v17, %v1012_v22  ;;  %v505_v23 = vadd.f32 %v761_v18, %v1012_v22 }
  0xf6   : > { %v432_v24 = vpop.f32.mrf.mxu0  ;;  %v496_v25 = vpop.f32.mrf.mxu1 }
  0xf7   : > { %564 = vst [vmem:[%s1020_s10 + $0x40] sm:$0xff] %v532_v19  ;;  %580 = vst [vmem:[%s1020_s10 + $0xc0] sm:$0xff] %v548_v20  ;;  %v535_v26 = vmax.f32 %v441_v21, 0.0  ;;  %v551_v27 = vmax.f32 %v505_v23, 0.0  ;;  %v433_v28 = vadd.f32 %v1012_v22, %v432_v24  ;;  %v497_v29 = vadd.f32 %v1012_v22, %v496_v25 }
  0xf8   : > { %v748_v30 = vpop.f32.mrf.mxu0  ;;  %v764_v31 = vpop.f32.mrf.mxu1 }
  0xf9   : > { %567 = vst [vmem:[%s1020_s10 + $0x58] sm:$0xff] %v535_v26  ;;  %583 = vst [vmem:[%s1020_s10 + $0xd8] sm:$0xff] %v551_v27  ;;  %v533_v32 = vmax.f32 %v433_v28, 0.0  ;;  %v549_v33 = vmax.f32 %v497_v29, 0.0  ;;  %v454_v34 = vadd.f32 %v748_v30, %v1012_v22  ;;  %v518_v35 = vadd.f32 %v764_v31, %v1012_v22 }
  0xfa   : > { %v445_v36 = vpop.f32.mrf.mxu0  ;;  %v509_v37 = vpop.f32.mrf.mxu1 }
  0xfb   : > { %565 = vst [vmem:[%s1020_s10 + $0x48] sm:$0xff] %v533_v32  ;;  %581 = vst [vmem:[%s1020_s10 + $0xc8] sm:$0xff] %v549_v33  ;;  %v538_v38 = vmax.f32 %v454_v34, 0.0  ;;  %v554_v39 = vmax.f32 %v518_v35, 0.0  ;;  %v446_v40 = vadd.f32 %v1012_v22, %v445_v36  ;;  %v510_v41 = vadd.f32 %v1012_v22, %v509_v37 }
  0xfc   : > { %v749_v42 = vpop.f32.mrf.mxu0  ;;  %v765_v43 = vpop.f32.mrf.mxu1 }
  0xfd   : > { %570 = vst [vmem:[%s1020_s10 + $0x70] sm:$0xff] %v538_v38  ;;  %586 = vst [vmem:[%s1020_s10 + $0xf0] sm:$0xff] %v554_v39  ;;  %v536_v44 = vmax.f32 %v446_v40, 0.0  ;;  %v552_v45 = vmax.f32 %v510_v41, 0.0  ;;  %v457_v46 = vadd.f32 %v749_v42, %v1012_v22  ;;  %v521_v47 = vadd.f32 %v765_v43, %v1012_v22 }
  0xfe   : > { %v448_v48 = vpop.f32.mrf.mxu0  ;;  %v512_v49 = vpop.f32.mrf.mxu1 }
  0xff   : > { %568 = vst [vmem:[%s1020_s10 + $0x60] sm:$0xff] %v536_v44  ;;  %584 = vst [vmem:[%s1020_s10 + $0xe0] sm:$0xff] %v552_v45  ;;  %v539_v50 = vmax.f32 %v457_v46, 0.0  ;;  %v555_v51 = vmax.f32 %v521_v47, 0.0  ;;  %v449_v52 = vadd.f32 %v1012_v22, %v448_v48  ;;  %v513_v53 = vadd.f32 %v1012_v22, %v512_v49 }
 0x101   : > { %571 = vst [vmem:[%s1020_s10 + $0x78] sm:$0xff] %v539_v50  ;;  %587 = vst [vmem:[%s1020_s10 + $0xf8] sm:$0xff] %v555_v51  ;;  %v537_v54 = vmax.f32 %v449_v52, 0.0  ;;  %v553_v55 = vmax.f32 %v513_v53, 0.0 }
 0x103   : > { %569 = vst [vmem:[%s1020_s10 + $0x68] sm:$0xff] %v537_v54  ;;  %585 = vst [vmem:[%s1020_s10 + $0xe8] sm:$0xff] %v553_v55 }
 0x104   : > { %843 = shalt.err (!%p840_p3)
}
 0x105   : > { %s844_s29 = scalar_lea.hbm %s1083_s24, 4096  ;;  %s848_s5 = scalar_lea.hbm %s1136_s3, 8192 }
 0x106   : > { %p845_p4 = scmp.ne.s32.totalorder %s1083_s24, %s844_s29  ;;  %p849_p9 = scmp.lt.s32.totalorder %s1083_s24, %s1136_s3 }
 0x107   : > { %p850_p10 = scmp.lt.s32.totalorder %s848_s5, %s844_s29 }
 0x108   : > { %p846_p7 = pnand %p845_p4, %p954_p5 }
 0x109   : > { %p851_p11 = por %p850_p10, %p849_p9 }
 0x10a   : > { %p847_p8 = pneg %p846_p7 }
 0x10c   : > { %p852_p12 = pnand %p851_p11, %p847_p8 }
 0x10e   : > { %855 = shalt.err (!%p852_p12)
}
 0x10f   : > { %s894_s8 = smov 128   ;;  %s895_s9 = smov 8  }
 0x110   : > { %770 = dma.vmem_to_hbm [thread:$0]  (%p954_p5), %s1085_s17, 4096, %s1083_s24, %s1093_s16, %s894_s8, %s894_s8, %s895_s9  }
 0x111 PF: > { %p776_p13 = scmp.ge.s32.totalorder %s890_s15, 2  ;;  %s617_s10 = sand.u32 1, %s878_s12  }
 0x112   : > { %s618_s11 = scalar_lea.sflag [#allocation3], %s617_s10 }
 0x113   : > { %p773_p0 = pnand %p776_p13, %p958_p6 }
 0x115   : > { %p774_p1 = pneg %p773_p0 }
 0x117   : > { %873 = dma.done.wait (%p774_p1), %s618_s11, 4096  }
 0x118   : > { %875 = vsyncadd (%p774_p1), %s618_s11, 4294963200  ;;  %p13_p2 = scmp.ge.s32.totalorder %s941_s18, 4   ;;  %s1139_s12 = smov %s882_s13 }
 0x119   : > { %s1140_s13 = smov %s886_s14  ;;  %s1141_s14 = smov %s952_s21 }
 0x11a   : > { %s1142_s15 = smov %s941_s18  ;;  %15 = sbr.rel (!%p13_p2) target bundleno = 3 (0x3), region = 67 }
 0x11f   :  { %623 = vsyncpa [#allocation3], 1 }
 0x120   :  { %625 = vsyncpa [#allocation3 + $0x1], 1 }

</bundles_post_ra>
